<compile_context>
chip_gen: v6e
topology: v6e:2x2x1
jax: 0.10.0
libtpu: 0.0.40
codegen_flags: <defaults>
</compile_context>

<pallas_src>
import functools

import jax
import jax.numpy as jnp
from jax import lax
from jax.experimental import pallas as pl
from jax.experimental.pallas import tpu as pltpu

_LANE = 128
_SUBLANE = 8


def _default_config():
    """(tile_rows, num_parts) tuned per TPU generation."""
    kind = ""
    try:
        kind = jax.devices()[0].device_kind.lower()
    except Exception:
        pass
    if ("v7" in kind) or ("tpu7" in kind) or ("7x" in kind):
        return 8192, 2          # 2 TensorCores/chip; 24 MiB double-buffered streams
    if "v6" in kind:
        return 8192, 1
    if "v5" in kind:
        return 4096, 1          # fits the 16 MiB scoped-VMEM default
    return 4096, 1


def _value_loss_kernel(clip_eps, n, tile_rows, blocks_per_part, blocks_total,
                       inv_n, v_ref, ov_ref, r_ref, out_ref, acc_ref):
    p = pl.program_id(0)          # "parallel" partition axis
    i = pl.program_id(1)          # "arbitrary" reduction axis within the partition

    @pl.when(i == 0)
    def _():
        acc_ref[...] = jnp.zeros_like(acc_ref)

    blk = p * blocks_per_part + i          # logical (unclamped) block index

    # Skip over-provisioned duplicate blocks entirely (index_map clamps their
    # data fetch to the last real block; we just don't accumulate them).
    @pl.when(blk < blocks_total)
    def _():
        v = v_ref[...].astype(jnp.float32)
        ov = ov_ref[...].astype(jnp.float32)
        r = r_ref[...].astype(jnp.float32)

        # values_clipped = old_values + clamp(values - old_values, -eps, eps)
        delta = jnp.clip(v - ov, -clip_eps, clip_eps)
        v_clipped = ov + delta
        surr1 = (v_clipped - r) ** 2
        surr2 = (v - r) ** 2
        loss = jnp.maximum(surr1, surr2)

        def accumulate(x):
            # Sublane-grouped partial reduce (tile_rows,128)->(8,128): pure VPU
            # adds; keeps the accumulator at 4 KiB of VMEM.
            acc_ref[...] += x.reshape(tile_rows // _SUBLANE, _SUBLANE,
                                      _LANE).sum(axis=0)

        # Interior blocks: fully valid (zero lane-padding lives only in the
        # last block, and the BlockSpec window is full) -> no element mask.
        @pl.when(blk != blocks_total - 1)
        def _():
            accumulate(loss)

        # Final block: mask the lane-padding tail AND any undefined rows of a
        # partial BlockSpec window (those rows are garbage, not zeros).
        @pl.when(blk == blocks_total - 1)
        def _():
            row_in_tile = lax.broadcasted_iota(jnp.int32, (tile_rows, _LANE), 0)
            lane_idx = lax.broadcasted_iota(jnp.int32, (tile_rows, _LANE), 1)
            row_global = blk * tile_rows + row_in_tile
            full_rows = n // _LANE          # static Python ints
            rem = n % _LANE
            valid = (row_global < full_rows) | (
                (row_global == full_rows) & (lane_idx < rem))
            accumulate(jnp.where(valid, loss, jnp.float32(0.0)))

    @pl.when(i == pl.num_programs(1) - 1)
    def _():
        # Fold the 1/n normalization into the single scalar SMEM write.
        out_ref[0, 0] = jnp.sum(acc_ref[...]) * inv_n


def value_loss(values, old_values, reward, action_mask=None, clip_eps: float = 0.4,
               tile_rows: int | None = None, num_parts: int | None = None):
    """Pallas TPU implementation of ValueLoss.forward (mean of clipped value loss)."""
    # TODO(synk): action_mask is accepted but unused, exactly as in the PyTorch reference forward.
    assert values.shape == old_values.shape == reward.shape
    n = int(values.size)

    dflt_tile, dflt_parts = _default_config()
    tile_rows = dflt_tile if tile_rows is None else int(tile_rows)
    num_parts = dflt_parts if num_parts is None else int(num_parts)

    v = values.reshape(-1)
    ov = old_values.reshape(-1)
    r = reward.reshape(-1)

    # Pad only when n is not lane-aligned (at most 127 extra elements).
    # TODO(synk): for large lane-misaligned inputs, provide lane-aligned n at the
    # call site to avoid the three XLA pad copies; the kernel's last-block mask
    # already handles any tail.
    n_pad = ((n + _LANE - 1) // _LANE) * _LANE
    if n_pad != n:
        pad = n_pad - n
        v = jnp.pad(v, (0, pad))
        ov = jnp.pad(ov, (0, pad))
        r = jnp.pad(r, (0, pad))

    rows = n_pad // _LANE
    v2 = v.reshape(rows, _LANE)
    ov2 = ov.reshape(rows, _LANE)
    r2 = r.reshape(rows, _LANE)

    # Keep the tile a multiple of 8 sublanes; shrink for tiny inputs.
    tile_rows = max(_SUBLANE, min(tile_rows,
                                  ((rows + _SUBLANE - 1) // _SUBLANE) * _SUBLANE))
    tile_rows = ((tile_rows + _SUBLANE - 1) // _SUBLANE) * _SUBLANE

    blocks_total = (rows + tile_rows - 1) // tile_rows
    num_parts = max(1, min(num_parts, blocks_total))
    blocks_per_part = (blocks_total + num_parts - 1) // num_parts

    def in_map(p, i):
        # Clamp over-provisioned blocks to the last real block; the kernel skips
        # their accumulation with a scalar pl.when.
        return (jnp.minimum(p * blocks_per_part + i, blocks_total - 1), 0)

    tile_spec = pl.BlockSpec((tile_rows, _LANE), in_map)

    itemsize = jnp.dtype(values.dtype).itemsize
    cost = pl.CostEstimate(
        flops=9 * n,
        transcendentals=0,
        bytes_accessed=3 * n * itemsize + num_parts * 4,
    )

    kernel = functools.partial(
        _value_loss_kernel, float(clip_eps), n, tile_rows, blocks_per_part,
        blocks_total, 1.0 / float(n))

    partials = pl.pallas_call(
        kernel,
        out_shape=jax.ShapeDtypeStruct((num_parts, 1), jnp.float32),
        grid_spec=pltpu.PrefetchScalarGridSpec(
            num_scalar_prefetch=0,
            grid=(num_parts, blocks_per_part),
            in_specs=[tile_spec, tile_spec, tile_spec],
            out_specs=pl.BlockSpec((1, 1), lambda p, i: (p, 0),
                                   memory_space=pltpu.MemorySpace.SMEM),
            scratch_shapes=[pltpu.VMEM((_SUBLANE, _LANE), jnp.float32)],
        ),
        compiler_params=pltpu.CompilerParams(
            dimension_semantics=("parallel", "arbitrary"),
        ),
        cost_estimate=cost,
    )(v2, ov2, r2)

    if num_parts == 1:
        return partials[0, 0]
    return jnp.sum(partials)


def _reference(values, old_values, reward, clip_eps=0.4):
    values_clipped = old_values + jnp.clip(values - old_values, -clip_eps, clip_eps)
    surr1 = (values_clipped - reward) ** 2
    surr2 = (values - reward) ** 2
    return jnp.mean(jnp.maximum(surr1, surr2))


if __name__ == "__main__":
    key = jax.random.PRNGKey(0)
    k1, k2, k3 = jax.random.split(key, 3)

    # Small shapes consistent with the module (PPO values over (batch, seq)).
    batch, seq = 2, 8
    values = jax.random.normal(k1, (batch, seq), dtype=jnp.float32)
    old_values = jax.random.normal(k2, (batch, seq), dtype=jnp.float32)
    reward = jax.random.normal(k3, (batch, seq), dtype=jnp.float32)

    loss = jax.block_until_ready(value_loss(values, old_values, reward, clip_eps=0.4))
    ref = _reference(values, old_values, reward, clip_eps=0.4)
    assert jnp.allclose(loss, ref, rtol=1e-5, atol=1e-6), (loss, ref)

    # Second check: lane-misaligned, multi-block, multi-partition path
    # (forces tiny tiles so interior/last-block and clamped-block logic run).
    k4, k5, k6 = jax.random.split(k3, 3)
    shape2 = (4, 1000)
    va = jax.random.normal(k4, shape2, dtype=jnp.float32)
    ob = jax.random.normal(k5, shape2, dtype=jnp.float32)
    rw = jax.random.normal(k6, shape2, dtype=jnp.float32)
    loss2 = jax.block_until_ready(
        value_loss(va, ob, rw, clip_eps=0.4, tile_rows=8, num_parts=2))
    ref2 = _reference(va, ob, rw, clip_eps=0.4)
    assert jnp.allclose(loss2, ref2, rtol=1e-5, atol=1e-5), (loss2, ref2)

    print("KERNEL_OK")
</pallas_src>

<mosaic_0001>
module attributes {stable_mosaic.version = 11 : i64} {
  func.func @_value_loss_kernel(%arg0: i32, %arg1: i32, %arg2: memref<8x128xf32, #tpu.memory_space<vmem>>, %arg3: memref<8x128xf32, #tpu.memory_space<vmem>>, %arg4: memref<8x128xf32, #tpu.memory_space<vmem>>, %arg5: memref<1x1xf32, #tpu.memory_space<smem>>, %arg6: memref<8x128xf32, #tpu.memory_space<vmem>>) attributes {dimension_semantics = [#tpu.dimension_semantics<parallel>, #tpu.dimension_semantics<arbitrary>], iteration_bounds = array<i64: 1, 1>, scalar_prefetch = 0 : i64, scratch_operands = 1 : i64, tpu.core_type = #tpu.core_type<tc>, window_params = [{transform_indices = @transform_0, window_bounds = array<i64: 8, 128>}, {transform_indices = @transform_1, window_bounds = array<i64: 8, 128>}, {transform_indices = @transform_2, window_bounds = array<i64: 8, 128>}, {transform_indices = @transform_3, window_bounds = array<i64: 1, 1>}]} {
    %c0_i32 = arith.constant 0 : i32
    %0 = arith.cmpi eq, %arg1, %c0_i32 : i32
    %1 = arith.extui %0 : i1 to i32
    %c0_i32_0 = arith.constant 0 : i32
    %2 = arith.cmpi ne, %1, %c0_i32_0 : i32
    scf.if %2 {
      %cst = arith.constant 0.000000e+00 : f32
      %11 = vector.broadcast %cst : f32 to vector<8x128xf32>
      %c0 = arith.constant 0 : index
      %c0_5 = arith.constant 0 : index
      %12 = vector.load %arg6[%c0, %c0_5] : memref<8x128xf32, #tpu.memory_space<vmem>>, vector<8x128xf32>
      tpu.vector_store %arg6[%c0, %c0_5], %11 {strides = array<i32>} : memref<8x128xf32, #tpu.memory_space<vmem>>, vector<8x128xf32>,
    } else {
    }
    %c1_i32 = arith.constant 1 : i32
    %3 = arith.muli %arg0, %c1_i32 : i32
    %4 = arith.addi %3, %arg1 : i32
    %c1_i32_1 = arith.constant 1 : i32
    %5 = arith.cmpi slt, %4, %c1_i32_1 : i32
    %6 = arith.extui %5 : i1 to i32
    %c0_i32_2 = arith.constant 0 : i32
    %7 = arith.cmpi ne, %6, %c0_i32_2 : i32
    scf.if %7 {
      %c0 = arith.constant 0 : index
      %c0_5 = arith.constant 0 : index
      %11 = vector.load %arg2[%c0, %c0_5] : memref<8x128xf32, #tpu.memory_space<vmem>>, vector<8x128xf32>
      %c0_6 = arith.constant 0 : index
      %c0_7 = arith.constant 0 : index
      %12 = vector.load %arg3[%c0_6, %c0_7] : memref<8x128xf32, #tpu.memory_space<vmem>>, vector<8x128xf32>
      %c0_8 = arith.constant 0 : index
      %c0_9 = arith.constant 0 : index
      %13 = vector.load %arg4[%c0_8, %c0_9] : memref<8x128xf32, #tpu.memory_space<vmem>>, vector<8x128xf32>
      %14 = arith.subf %11, %12 : vector<8x128xf32>
      %cst = arith.constant -4.000000e-01 : f32
      %cst_10 = arith.constant 4.000000e-01 : f32
      %15 = vector.broadcast %cst : f32 to vector<8x128xf32>
      %16 = arith.maximumf %15, %14 : vector<8x128xf32>
      %17 = vector.broadcast %cst_10 : f32 to vector<8x128xf32>
      %18 = arith.minimumf %17, %16 : vector<8x128xf32>
      %19 = arith.addf %12, %18 : vector<8x128xf32>
      %20 = arith.subf %19, %13 : vector<8x128xf32>
      %21 = arith.mulf %20, %20 : vector<8x128xf32>
      %22 = arith.subf %11, %13 : vector<8x128xf32>
      %23 = arith.mulf %22, %22 : vector<8x128xf32>
      %24 = arith.maximumf %21, %23 : vector<8x128xf32>
      %c0_i32_11 = arith.constant 0 : i32
      %25 = arith.cmpi ne, %4, %c0_i32_11 : i32
      %26 = arith.extui %25 : i1 to i32
      %c0_i32_12 = arith.constant 0 : i32
      %27 = arith.cmpi ne, %26, %c0_i32_12 : i32
      scf.if %27 {
        %c0_15 = arith.constant 0 : index
        %c0_16 = arith.constant 0 : index
        %31 = vector.load %arg6[%c0_15, %c0_16] : memref<8x128xf32, #tpu.memory_space<vmem>>, vector<8x128xf32>
        %32 = vector.shape_cast %24 : vector<8x128xf32> to vector<1x8x128xf32>
        %cst_17 = arith.constant dense<0.000000e+00> : vector<8x128xf32>
        %33 = vector.multi_reduction <add>, %32, %cst_17 [0] : vector<1x8x128xf32> to vector<8x128xf32>
        %34 = arith.addf %31, %33 : vector<8x128xf32>
        %c0_18 = arith.constant 0 : index
        %c0_19 = arith.constant 0 : index
        %35 = vector.load %arg6[%c0_18, %c0_19] : memref<8x128xf32, #tpu.memory_space<vmem>>, vector<8x128xf32>
        tpu.vector_store %arg6[%c0_18, %c0_19], %34 {strides = array<i32>} : memref<8x128xf32, #tpu.memory_space<vmem>>, vector<8x128xf32>,
      } else {
      }
      %c0_i32_13 = arith.constant 0 : i32
      %28 = arith.cmpi eq, %4, %c0_i32_13 : i32
      %29 = arith.extui %28 : i1 to i32
      %c0_i32_14 = arith.constant 0 : i32
      %30 = arith.cmpi ne, %29, %c0_i32_14 : i32
      scf.if %30 {
        %31 = tpu.iota {dimensions = array<i32: 0>} : vector<8x128xi32>
        %32 = tpu.iota {dimensions = array<i32: 1>} : vector<8x128xi32>
        %c8_i32 = arith.constant 8 : i32
        %33 = arith.muli %4, %c8_i32 : i32
        %34 = vector.broadcast %33 : i32 to vector<8x128xi32>
        %35 = arith.addi %34, %31 : vector<8x128xi32>
        %c0_i32_15 = arith.constant 0 : i32
        %36 = vector.broadcast %c0_i32_15 : i32 to vector<8x128xi32>
        %37 = arith.cmpi slt, %35, %36 : vector<8x128xi32>
        %c0_i32_16 = arith.constant 0 : i32
        %38 = vector.broadcast %c0_i32_16 : i32 to vector<8x128xi32>
        %39 = arith.cmpi eq, %35, %38 : vector<8x128xi32>
        %c16_i32 = arith.constant 16 : i32
        %40 = vector.broadcast %c16_i32 : i32 to vector<8x128xi32>
        %41 = arith.cmpi slt, %32, %40 : vector<8x128xi32>
        %42 = arith.andi %39, %41 : vector<8x128xi1>
        %43 = arith.ori %37, %42 : vector<8x128xi1>
        %cst_17 = arith.constant 0.000000e+00 : f32
        %44 = vector.broadcast %cst_17 : f32 to vector<8x128xf32>
        %45 = arith.select %43, %24, %44 : vector<8x128xi1>, vector<8x128xf32>
        %c0_18 = arith.constant 0 : index
        %c0_19 = arith.constant 0 : index
        %46 = vector.load %arg6[%c0_18, %c0_19] : memref<8x128xf32, #tpu.memory_space<vmem>>, vector<8x128xf32>
        %47 = vector.shape_cast %45 : vector<8x128xf32> to vector<1x8x128xf32>
        %cst_20 = arith.constant dense<0.000000e+00> : vector<8x128xf32>
        %48 = vector.multi_reduction <add>, %47, %cst_20 [0] : vector<1x8x128xf32> to vector<8x128xf32>
        %49 = arith.addf %46, %48 : vector<8x128xf32>
        %c0_21 = arith.constant 0 : index
        %c0_22 = arith.constant 0 : index
        %50 = vector.load %arg6[%c0_21, %c0_22] : memref<8x128xf32, #tpu.memory_space<vmem>>, vector<8x128xf32>
        tpu.vector_store %arg6[%c0_21, %c0_22], %49 {strides = array<i32>} : memref<8x128xf32, #tpu.memory_space<vmem>>, vector<8x128xf32>,
      } else {
      }
    } else {
    }
    %c0_i32_3 = arith.constant 0 : i32
    %8 = arith.cmpi eq, %arg1, %c0_i32_3 : i32
    %9 = arith.extui %8 : i1 to i32
    %c0_i32_4 = arith.constant 0 : i32
    %10 = arith.cmpi ne, %9, %c0_i32_4 : i32
    scf.if %10 {
      %c0 = arith.constant 0 : index
      %c0_5 = arith.constant 0 : index
      %11 = vector.load %arg6[%c0, %c0_5] : memref<8x128xf32, #tpu.memory_space<vmem>>, vector<8x128xf32>
      %12 = vector.shape_cast %11 : vector<8x128xf32> to vector<1x8x128xf32>
      %cst = arith.constant dense<0.000000e+00> : vector<1xf32>
      %13 = vector.multi_reduction <add>, %12, %cst [1, 2] : vector<1x8x128xf32> to vector<1xf32>
      %14 = vector.shape_cast %13 : vector<1xf32> to vector<1x1x1xf32>
      %15 = vector.extract %14[0, 0, 0] : f32 from vector<1x1x1xf32>
      %cst_6 = arith.constant 6.250000e-02 : f32
      %16 = arith.mulf %15, %cst_6 : f32
      %c0_7 = arith.constant 0 : index
      %c0_8 = arith.constant 0 : index
      %17 = memref.load %arg5[%c0_7, %c0_8] : memref<1x1xf32, #tpu.memory_space<smem>>
      memref.store %16, %arg5[%c0_7, %c0_8] : memref<1x1xf32, #tpu.memory_space<smem>>
    } else {
    }
    return
  }
  func.func @transform_0(%arg0: i32, %arg1: i32) -> (i32, i32) {
    %c1_i32 = arith.constant 1 : i32
    %0 = arith.muli %arg0, %c1_i32 : i32
    %1 = arith.addi %0, %arg1 : i32
    %c0_i32 = arith.constant 0 : i32
    %2 = arith.minsi %1, %c0_i32 : i32
    %c0_i32_0 = arith.constant 0 : i32
    %c0_i32_1 = arith.constant 0 : i32
    return %2, %c0_i32_0 : i32, i32
  }
  func.func @transform_1(%arg0: i32, %arg1: i32) -> (i32, i32) {
    %c1_i32 = arith.constant 1 : i32
    %0 = arith.muli %arg0, %c1_i32 : i32
    %1 = arith.addi %0, %arg1 : i32
    %c0_i32 = arith.constant 0 : i32
    %2 = arith.minsi %1, %c0_i32 : i32
    %c0_i32_0 = arith.constant 0 : i32
    %c0_i32_1 = arith.constant 0 : i32
    return %2, %c0_i32_0 : i32, i32
  }
  func.func @transform_2(%arg0: i32, %arg1: i32) -> (i32, i32) {
    %c1_i32 = arith.constant 1 : i32
    %0 = arith.muli %arg0, %c1_i32 : i32
    %1 = arith.addi %0, %arg1 : i32
    %c0_i32 = arith.constant 0 : i32
    %2 = arith.minsi %1, %c0_i32 : i32
    %c0_i32_0 = arith.constant 0 : i32
    %c0_i32_1 = arith.constant 0 : i32
    return %2, %c0_i32_0 : i32, i32
  }
  func.func @transform_3(%arg0: i32, %arg1: i32) -> (i32, i32) {
    %c0_i32 = arith.constant 0 : i32
    %c0_i32_0 = arith.constant 0 : i32
    return %arg0, %c0_i32 : i32, i32
  }
}

</mosaic_0001>

<bundles_post_ra>
// kernel: tpu_custom_call.1
= control target key start
LH: loop header
LB: loop body
LE: loop exit
PB: predicated region body
PF: predicated region fallthrough
CT: control target
= control target key end

     0   :  { %8 = vsyncpa [#allocation4], 0  ;;  %s286_s0 = inlined_call_operand.hbm [shape: f32[1,128], index: 0, kind: input, shape index: {}]   ;;  %s287_s1 = inlined_call_operand.vmem [shape: f32[1,128], index: 1, kind: input, shape index: {}]   ;;  %s288_s2 = inlined_call_operand.vmem [shape: f32[1,128], index: 2, kind: input, shape index: {}]   ;;  %s289_s3 = inlined_call_operand.hbm [shape: f32[1,1], index: 3, kind: output, shape index: {}]  }
   0x1   :  { %9 = vsyncpa [#allocation5], 0 }
   0x2   :  { %20 = vsyncadd [#allocation4], 112  ;;  %s250_s12 = smov [#allocation3]  }
   0x3   :  { %s24_s13 = sshll.u32 %s250_s12, 4  ;;  %s25_s13 = int_to_ptr.vmem [resolvable:$true] %s24_s13 }
   0x4   :  { %s226_s14 = scalar_lea.vmem %s25_s13, 16  ;;  %s230_s15 = scalar_lea.vmem %s25_s13, 128 }
   0x5   :  { %p227_p0 = scmp.ne.s32.totalorder %s25_s13, %s226_s14  ;;  %p231_p1 = scmp.lt.s32.totalorder %s25_s13, %s25_s13 }
   0x6   :  { %p232_p2 = scmp.lt.s32.totalorder %s230_s15, %s226_s14 }
   0x8   :  { %p233_p3 = por %p232_p2, %p231_p1 }
   0xa   :  { %p234_p4 = pnand %p233_p3, %p227_p0 }
   0xc   :  { %237 = shalt.err (!%p234_p4)
}
   0xd   :  { %s251_s16 = smov 16   ;;  %s252_s17 = smov 1  }
   0xe   :  { %30 = dma.hbm_to_vmem [thread:$0]  %s286_s0, 16, %s25_s13, [#allocation4], %s251_s16, %s251_s16, %s252_s17  }
   0xf   :  { %246 = dma.done.wait [#allocation4], 128  }
  0x10   :  { %247 = vsyncadd [#allocation4], 4294967168  ;;  %v156_v0 = vlaneseq  ;;  %v132_v1 = vld [vmem:[#allocation3] sm:$0xff] }
  0x11   :  { %v133_v2 = vld [vmem:[%s287_s1] sm:$0xff] }
  0x12   :  { %v134_v3 = vld [vmem:[%s288_s2] sm:$0xff]  ;;  %v135_v4 = vsub.f32 %v132_v1, %v133_v2  ;;  %v157_v7 = vshrl.u32 %v156_v0, 7  ;;  %v159_v8 = vand.u32 127, %v156_v0  ;;  %s253_s2 = smov [#allocation6]  }
  0x13   :  { %v141_v6 = vsub.f32 %v132_v1, %v134_v3 }
  0x14   :  { %v211_v5 = vclamps-f32 %v135_v4, 0.4  ;;  %vm164_vm0 = vcmp.eq.s32.totalorder %v157_v7, 0  ;;  %vm165_vm1 = vcmp.lt.s32.totalorder %v159_v8, 16 }
  0x15   :  { %v142_v11 = vmul.f32 %v141_v6, %v141_v6  ;;  %vm166_vm2 = vmand %vm164_vm0, %vm165_vm1 }
  0x16   :  { %v138_v9 = vadd.f32 %v211_v5, %v133_v2 }
  0x18   :  { %v139_v10 = vsub.f32 %v138_v9, %v134_v3 }
  0x1a   :  { %v140_v12 = vmul.f32 %v139_v10, %v139_v10 }
  0x1c   :  { %v143_v13 = vmax.f32 %v140_v12, %v142_v11 }
  0x1e   :  { %v168_v14 = vsel %vm166_vm2, %v143_v13, 0.0 }
  0x1f   :  { %177 = vadd.xlane.f32.xlu0 %v168_v14 }
  0xa8   :  { %v178_v15 = vpop.xlane.xlu0 %177 }
  0xa9   :  { %v179_v16 = vrot.slane %v178_v15, 4 }
  0xab   :  { %v180_v17 = vadd.f32 %v179_v16, %v178_v15 }
  0xad   :  { %v181_v18 = vrot.slane %v180_v17, 2 }
  0xaf   :  { %v182_v19 = vadd.f32 %v181_v18, %v180_v17 }
  0xb1   :  { %v183_v20 = vrot.slane %v182_v19, 1 }
  0xb3   :  { %v184_v21 = vadd.f32 %v183_v20, %v182_v19 }
  0xb5   :  { %212 = vpush %v184_v21 }
  0xe6   :  { %s213_s0 = spop %212 }
  0xe7   :  { %s186_s1 = smul.f32 0.0625, %s213_s0 }
  0xe9   :  { %188 = sst [smem:[#allocation6]] %s186_s1 }
  0xea   :  { %196 = dma.smem_to_hbm %s253_s2, 16, %s289_s3, [#allocation5]  }
  0xeb   :  { %248 = dma.done.wait [#allocation5], 16  }
  0xec   :  { %249 = vsyncadd [#allocation5], 4294967280 }
  0xed   :  { %200 = sfence }
  0xee   :  { %201 = vsyncpa [#allocation4], 1 }
  0xef   :  { %202 = vsyncpa [#allocation5], 1 }

</bundles_post_ra>
